<compile_context>
chip_gen: v7x
topology: tpu7x:2x2x1
jax: 0.10.0
libtpu: 0.0.40
codegen_flags: <defaults>
</compile_context>

<pallas_src>
import functools

import jax
import jax.numpy as jnp
from jax import lax
from jax.experimental import pallas as pl
from jax.experimental.pallas import tpu as pltpu


def _round_up(x, m):
    return -(-x // m) * m


def _vmem_limit_bytes():
    # Generation-aware budget: ~60% of physical VMEM, capped at 48 MiB
    # (v5e/v6e: 128 MiB physical -> 48 MiB; v7x: 64 MiB physical -> ~38 MiB).
    try:
        cap = int(pltpu.get_tpu_info().vmem_capacity_bytes)
    except Exception:
        cap = 128 * 1024 * 1024
    return int(max(min(0.6 * cap, 48 * 1024 * 1024), 16 * 1024 * 1024))


def _block_kernel(xg_ref, w1_ref, w2_ref, bias_ref, out_ref, h1_ref, *,
                  Q, K, p, TL, TE, O_pad, L_out, conv1_accum, conv2_accum):
    t = pl.program_id(1)

    # ---- conv1 (stride folded into Q tap groups) + fused 1x1 shortcut -------
    # z rows [0, O_pad)      : BN1-scaled conv1 (pre-bias)
    # z rows [O_pad, 2*O_pad): BN_sc-scaled 1x1 shortcut (pre-bias)
    if conv1_accum:
        # accumulate Q matmuls straight off the input block (no big temp)
        z = jnp.dot(w1_ref[0], xg_ref[0, 0, :, pl.ds(0, TE)],
                    preferred_element_type=jnp.float32)
        for q in range(1, Q):
            z = z + jnp.dot(w1_ref[q], xg_ref[0, 0, :, pl.ds(q, TE)],
                            preferred_element_type=jnp.float32)
    else:
        # tiny contraction: single matmul over a small concatenated im2col slab
        taps = [xg_ref[0, 0, :, pl.ds(q, TE)] for q in range(Q)]
        x1 = taps[0] if Q == 1 else jnp.concatenate(taps, axis=0)
        z = jnp.dot(w1_ref[...], x1, preferred_element_type=jnp.float32)

    b1 = bias_ref[:, 0:1]     # (O_pad, 1)  BN1 shift
    bo = bias_ref[:, 1:2]     # (O_pad, 1)  BN2 shift + BN_sc shift

    # ReLU(BN1(conv1)) over the extended (halo) window, f32 epilogue.
    h1 = jnp.maximum(z[:O_pad, :] + b1, 0.0)                      # (O_pad, TE)

    # conv2's 'same' zero padding + recomputed tile halo: columns whose global
    # position lies outside [0, L_out) must be exactly zero.
    jj = lax.broadcasted_iota(jnp.int32, (1, TE), 1)
    m = t * TL - p + jj
    h1 = jnp.where((m >= 0) & (m < L_out), h1, 0.0)
    h1_ref[...] = h1.astype(h1_ref.dtype)

    # ---- conv2 (stride 1, 'same') + shortcut + BN shifts + output ReLU ------
    acc = z[O_pad:, p:p + TL] + bo                                # (O_pad, TL)
    if conv2_accum:
        # accumulate K matmuls from ref tap-slices of the h1 scratch
        for k in range(K):
            acc = acc + jnp.dot(w2_ref[k], h1_ref[:, pl.ds(k, TL)],
                                preferred_element_type=jnp.float32)
    else:
        taps2 = [h1_ref[:, pl.ds(k, TL)] for k in range(K)]
        x2 = taps2[0] if K == 1 else jnp.concatenate(taps2, axis=0)
        acc = acc + jnp.dot(w2_ref[...], x2, preferred_element_type=jnp.float32)

    # lane-dense (O_pad x TL aligned) store, NCL channel-major layout
    out_ref[0, :, :] = jnp.maximum(acc, 0.0).astype(out_ref.dtype)


def resnet_basic_block(x_ncl, params, *, stride, mxu_dtype=jnp.bfloat16,
                       max_tile_l=512):
    """x_ncl: (B, C_in, L) float32 (PyTorch NCL). Returns (B, O, L_out) f32."""
    w1, w2, wsc = params['w1'], params['w2'], params['wsc']
    O, C_in, K = w1.shape
    B, C, L = x_ncl.shape
    assert C == C_in
    assert K % 2 == 1, "residual add requires odd filter_length ('same' convs)"
    mxu_dtype = jnp.dtype(mxu_dtype)

    s = int(stride)
    p = (K - 1) // 2
    L_out = (L + 2 * p - K) // s + 1
    Q = -(-K // s)                       # ceil(K/stride): tap groups
    SC = s * C_in                        # regrouped input rows per tap group

    row_mult = 16 if mxu_dtype.itemsize == 2 else 8   # sublane packing
    SC_pad = _round_up(SC, row_mult)
    O_pad = _round_up(O, row_mult)

    TL = min(max_tile_l, _round_up(L_out, 128))       # lane tile (128-mult)
    n_tiles = -(-L_out // TL)
    L_out_pad = n_tiles * TL
    TE = TL + 2 * p                      # extended cols (conv2 halo recompute)
    TW = TE + Q - 1                      # input window lanes per tile

    conv1_accum = Q * SC_pad > 128       # accumulate vs. tiny-concat (review)
    conv2_accum = K * O_pad > 128

    # ---- input: one fused pad, space-to-depth regroup, per-tile windows -----
    # xg[b, r*C_in+c, g] = x_samepad[b, c, (g-p)*s + r]  (p-group left shift
    # folded into the single pad);  window for tile t = lanes [t*TL, t*TL+TW).
    xc = x_ncl.astype(mxu_dtype)
    G_need = L_out_pad + p + Q - 1
    tot = (p + G_need) * s
    left = p * (s + 1)
    xpn = jnp.pad(xc, ((0, 0), (0, 0), (left, max(0, tot - left - L))))
    xpn = xpn[:, :, :tot]
    xg = (xpn.reshape(B, C_in, p + G_need, s)
              .transpose(0, 3, 1, 2)
              .reshape(B, SC, p + G_need))
    if SC_pad > SC:
        xg = jnp.pad(xg, ((0, 0), (0, SC_pad - SC), (0, 0)))
    if n_tiles == 1:
        xg_tiles = xg[:, None, :, :TW]
    else:
        xg_tiles = jnp.stack(
            [lax.slice_in_dim(xg, t * TL, t * TL + TW, axis=2)
             for t in range(n_tiles)], axis=1)        # (B, n_tiles, SC_pad, TW)

    # ---- fold eval-mode BN into conv weights (scale) and shifts (bias) ------
    def fold_bn(prm, eps=1e-5):
        g, beta, mean, var = prm
        sc = g / jnp.sqrt(var + eps)
        return sc.astype(jnp.float32), (beta - mean * sc).astype(jnp.float32)

    s1, b1 = fold_bn(params['bn1'])
    s2, b2 = fold_bn(params['bn2'])
    ssc, bsc = fold_bn(params['bn_sc'])

    w1s = w1.astype(jnp.float32) * s1[:, None, None]          # (O, C_in, K)
    w2s = w2.astype(jnp.float32) * s2[:, None, None]          # (O, O,   K)
    wscs = wsc[:, :, 0].astype(jnp.float32) * ssc[:, None]    # (O, C_in)

    # conv1 + fused shortcut weight, regrouped (tap k = q*stride + r).
    W1 = jnp.zeros((2 * O_pad, Q, SC_pad), jnp.float32)
    for k in range(K):
        q, r = divmod(k, s)
        W1 = W1.at[:O, q, r * C_in:(r + 1) * C_in].set(w1s[:, :, k])
    qc, rc = divmod(p, s)                                     # centre tap
    W1 = W1.at[O_pad:O_pad + O, qc, rc * C_in:(rc + 1) * C_in].set(wscs)
    if conv1_accum:
        W1 = jnp.transpose(W1, (1, 0, 2))                     # (Q, 2*O_pad, SC_pad)
    else:
        W1 = W1.reshape(2 * O_pad, Q * SC_pad)
    W1 = W1.astype(mxu_dtype)

    W2 = jnp.zeros((K, O_pad, O_pad), jnp.float32)
    W2 = W2.at[:, :O, :O].set(jnp.transpose(w2s, (2, 0, 1)))
    if not conv2_accum:
        W2 = jnp.transpose(W2, (1, 0, 2)).reshape(O_pad, K * O_pad)
    W2 = W2.astype(mxu_dtype)

    bias_mat = jnp.zeros((O_pad, 2), jnp.float32)
    bias_mat = bias_mat.at[:O, 0].set(b1)
    bias_mat = bias_mat.at[:O, 1].set(b2 + bsc)

    # ---- specs -------------------------------------------------------------
    if conv1_accum:
        w1_spec = pl.BlockSpec((Q, 2 * O_pad, SC_pad), lambda b, t: (0, 0, 0))
    else:
        w1_spec = pl.BlockSpec((2 * O_pad, Q * SC_pad), lambda b, t: (0, 0))
    if conv2_accum:
        w2_spec = pl.BlockSpec((K, O_pad, O_pad), lambda b, t: (0, 0, 0))
    else:
        w2_spec = pl.BlockSpec((O_pad, K * O_pad), lambda b, t: (0, 0))

    grid_spec = pltpu.PrefetchScalarGridSpec(
        num_scalar_prefetch=0,
        grid=(B, n_tiles),
        in_specs=[
            pl.BlockSpec((1, 1, SC_pad, TW), lambda b, t: (b, t, 0, 0)),
            w1_spec,                                   # weights: fetched once
            w2_spec,
            pl.BlockSpec((O_pad, 2), lambda b, t: (0, 0)),
        ],
        out_specs=pl.BlockSpec((1, O_pad, TL), lambda b, t: (b, 0, t)),
        scratch_shapes=[pltpu.VMEM((O_pad, TE), mxu_dtype)],   # h1 (+halo)
    )

    kernel = functools.partial(
        _block_kernel, Q=Q, K=K, p=p, TL=TL, TE=TE, O_pad=O_pad,
        L_out=L_out, conv1_accum=conv1_accum, conv2_accum=conv2_accum)

    out = pl.pallas_call(
        kernel,
        out_shape=jax.ShapeDtypeStruct((B, O_pad, L_out_pad), jnp.float32),
        grid_spec=grid_spec,
        compiler_params=pltpu.CompilerParams(
            dimension_semantics=("parallel", "parallel"),
            vmem_limit_bytes=_vmem_limit_bytes()),
    )(xg_tiles, W1, W2, bias_mat)

    return out[:, :O, :L_out]


def reference(x_ncl, params, *, stride):
    """Pure-JAX (XLA, f32 HIGHEST) reference mirroring the PyTorch forward."""
    w1, w2, wsc = params['w1'], params['w2'], params['wsc']
    K = w1.shape[-1]
    p = (K - 1) // 2

    def conv1d(x, w, s, pad):
        return lax.conv_general_dilated(
            x, w, window_strides=(s,), padding=[(pad, pad)],
            dimension_numbers=('NCH', 'OIH', 'NCH'),
            precision=lax.Precision.HIGHEST)

    def bn(x, prm, eps=1e-5):
        g, b, m, v = prm
        s = g / jnp.sqrt(v + eps)
        return x * s[None, :, None] + (b - m * s)[None, :, None]

    y = jax.nn.relu(bn(conv1d(x_ncl, w1, stride, p), params['bn1']))
    y = bn(conv1d(y, w2, 1, p), params['bn2'])
    sc = bn(conv1d(x_ncl, wsc, stride, 0), params['bn_sc'])
    return jax.nn.relu(y + sc)


if __name__ == "__main__":
    key = jax.random.PRNGKey(0)

    def make_params(k, C_in, O, K):
        ks = jax.random.split(k, 16)

        def he(kk, shape, fan_in):
            return jax.random.normal(kk, shape, jnp.float32) * jnp.sqrt(2.0 / fan_in)

        def bn(k0, k1, k2, k3, n):
            gamma = 1.0 + 0.1 * jax.random.normal(ks[k0], (n,), jnp.float32)
            beta = 0.1 * jax.random.normal(ks[k1], (n,), jnp.float32)
            mean = 0.1 * jax.random.normal(ks[k2], (n,), jnp.float32)
            var = 0.5 + jax.random.uniform(ks[k3], (n,), jnp.float32)
            return (gamma, beta, mean, var)

        prm = {
            'w1': he(ks[0], (O, C_in, K), C_in * K),
            'w2': he(ks[1], (O, O, K), O * K),
            'wsc': he(ks[2], (O, C_in, 1), C_in),
            'bn1': bn(3, 4, 5, 6, O),
            'bn2': bn(7, 8, 9, 10, O),
            'bn_sc': bn(11, 12, 13, 14, O),
        }
        return prm, ks[15]

    cases = [
        # (B, C_in, L,  O,  K, stride): tiny case (concat branches, stride 2,
        # non-multiple-of-8 channels, single 128-lane tile)
        (2, 3, 50, 12, 5, 2),
        # larger case (accumulating-matmul branches, stride 1, 2 lane tiles,
        # right-edge halo masking inside the last tile)
        (2, 96, 700, 160, 3, 1),
    ]

    for i, (B, C_in, L, O, K, stride) in enumerate(cases):
        key, sub = jax.random.split(key)
        params, xkey = make_params(sub, C_in, O, K)
        x = jax.random.normal(xkey, (B, C_in, L), jnp.float32)

        ref = reference(x, params, stride=stride)
        L_out = (L - 1) // stride + 1
        assert ref.shape == (B, O, L_out), ref.shape

        # exact-precision path (f32 MXU operands): tight tolerance
        out32 = jax.block_until_ready(
            resnet_basic_block(x, params, stride=stride, mxu_dtype=jnp.float32))
        assert out32.shape == (B, O, L_out), out32.shape
        err32 = float(jnp.max(jnp.abs(out32 - ref)))
        assert jnp.allclose(out32, ref, atol=1e-3, rtol=1e-3), (i, err32)

        # default perf path (bf16 MXU operands, f32 accumulation/epilogue):
        # looser tolerance accounts for bf16 operand rounding vs f32 reference.
        outbf = jax.block_until_ready(
            resnet_basic_block(x, params, stride=stride, mxu_dtype=jnp.bfloat16))
        assert outbf.shape == (B, O, L_out), outbf.shape
        errbf = float(jnp.max(jnp.abs(outbf - ref)))
        assert jnp.allclose(outbf, ref, atol=5e-2, rtol=5e-2), (i, errbf)

    print("KERNEL_OK")
</pallas_src>

<mosaic_0001>
module attributes {stable_mosaic.version = 11 : i64} {
  func.func @_block_kernel(%arg0: i32, %arg1: i32, %arg2: memref<1x1x8x134xf32, #tpu.memory_space<vmem>>, %arg3: memref<32x24xf32, #tpu.memory_space<vmem>>, %arg4: memref<16x80xf32, #tpu.memory_space<vmem>>, %arg5: memref<16x2xf32, #tpu.memory_space<vmem>>, %arg6: memref<1x16x128xf32, #tpu.memory_space<vmem>>, %arg7: memref<16x132xf32, #tpu.memory_space<vmem>>) attributes {dimension_semantics = [#tpu.dimension_semantics<parallel>, #tpu.dimension_semantics<parallel>], iteration_bounds = array<i64: 2, 1>, scalar_prefetch = 0 : i64, scratch_operands = 1 : i64, tpu.core_type = #tpu.core_type<tc>, window_params = [{transform_indices = @transform_0, window_bounds = array<i64: 1, 1, 8, 134>}, {pipeline_mode = #tpu.pipeline_mode<synchronous>, transform_indices = @transform_1, window_bounds = array<i64: 32, 24>}, {pipeline_mode = #tpu.pipeline_mode<synchronous>, transform_indices = @transform_2, window_bounds = array<i64: 16, 80>}, {pipeline_mode = #tpu.pipeline_mode<synchronous>, transform_indices = @transform_3, window_bounds = array<i64: 16, 2>}, {transform_indices = @transform_4, window_bounds = array<i64: 1, 16, 128>}]} {
    %c0 = arith.constant 0 : index
    %c0_0 = arith.constant 0 : index
    %c0_1 = arith.constant 0 : index
    %c0_2 = arith.constant 0 : index
    %0 = vector.load %arg2[%c0, %c0_0, %c0_1, %c0_2] : memref<1x1x8x134xf32, #tpu.memory_space<vmem>>, vector<1x1x8x132xf32>
    %1 = vector.shape_cast %0 : vector<1x1x8x132xf32> to vector<8x132xf32>
    %c0_3 = arith.constant 0 : index
    %c0_4 = arith.constant 0 : index
    %c0_5 = arith.constant 0 : index
    %c1 = arith.constant 1 : index
    %2 = vector.load %arg2[%c0_3, %c0_4, %c0_5, %c1] : memref<1x1x8x134xf32, #tpu.memory_space<vmem>>, vector<1x1x8x132xf32>
    %3 = vector.shape_cast %2 : vector<1x1x8x132xf32> to vector<8x132xf32>
    %c0_6 = arith.constant 0 : index
    %c0_7 = arith.constant 0 : index
    %c0_8 = arith.constant 0 : index
    %c2 = arith.constant 2 : index
    %4 = vector.load %arg2[%c0_6, %c0_7, %c0_8, %c2] : memref<1x1x8x134xf32, #tpu.memory_space<vmem>>, vector<1x1x8x132xf32>
    %5 = vector.shape_cast %4 : vector<1x1x8x132xf32> to vector<8x132xf32>
    %6 = tpu.concatenate %1, %3, %5 in 0 : vector<8x132xf32>, vector<8x132xf32>, vector<8x132xf32> -> vector<24x132xf32>
    %c0_9 = arith.constant 0 : index
    %c0_10 = arith.constant 0 : index
    %7 = vector.load %arg3[%c0_9, %c0_10] : memref<32x24xf32, #tpu.memory_space<vmem>>, vector<32x24xf32>
    %cst = arith.constant dense<0.000000e+00> : vector<32x132xf32>
    %8 = tpu.matmul %7, %6, %cst {dimension_numbers = #tpu.dot_dimension_numbers<[1], [0], [0], [1], [0, 0, 1, 1], [], []>} : vector<32x24xf32>, vector<24x132xf32>, vector<32x132xf32> -> vector<32x132xf32>
    %c0_11 = arith.constant 0 : index
    %c0_12 = arith.constant 0 : index
    %9 = vector.load %arg5[%c0_11, %c0_12] : memref<16x2xf32, #tpu.memory_space<vmem>>, vector<16x1xf32>
    %c0_13 = arith.constant 0 : index
    %c1_14 = arith.constant 1 : index
    %10 = vector.load %arg5[%c0_13, %c1_14] : memref<16x2xf32, #tpu.memory_space<vmem>>, vector<16x1xf32>
    %11 = vector.extract_strided_slice %8 {offsets = [0, 0], sizes = [16, 132], strides = [1, 1]} : vector<32x132xf32> to vector<16x132xf32>
    %12 = vector.broadcast %9 : vector<16x1xf32> to vector<16x132xf32>
    %13 = arith.addf %11, %12 : vector<16x132xf32>
    %cst_15 = arith.constant 0.000000e+00 : f32
    %14 = vector.broadcast %cst_15 : f32 to vector<16x132xf32>
    %15 = arith.maximumf %13, %14 : vector<16x132xf32>
    %16 = tpu.iota {dimensions = array<i32: 1>} : vector<1x132xi32>
    %c128_i32 = arith.constant 128 : i32
    %17 = arith.muli %arg1, %c128_i32 : i32
    %c2_i32 = arith.constant 2 : i32
    %18 = arith.subi %17, %c2_i32 : i32
    %19 = vector.broadcast %18 : i32 to vector<1x132xi32>
    %20 = arith.addi %19, %16 : vector<1x132xi32>
    %c0_i32 = arith.constant 0 : i32
    %21 = vector.broadcast %c0_i32 : i32 to vector<1x132xi32>
    %22 = arith.cmpi sge, %20, %21 : vector<1x132xi32>
    %c25_i32 = arith.constant 25 : i32
    %23 = vector.broadcast %c25_i32 : i32 to vector<1x132xi32>
    %24 = arith.cmpi slt, %20, %23 : vector<1x132xi32>
    %25 = arith.andi %22, %24 : vector<1x132xi1>
    %cst_16 = arith.constant 0.000000e+00 : f32
    %26 = vector.shape_cast %25 : vector<1x132xi1> to vector<1x132xi1>
    %27 = vector.broadcast %26 : vector<1x132xi1> to vector<16x132xi1>
    %28 = vector.broadcast %cst_16 : f32 to vector<16x132xf32>
    %29 = arith.select %27, %15, %28 : vector<16x132xi1>, vector<16x132xf32>
    %c0_17 = arith.constant 0 : index
    %c0_18 = arith.constant 0 : index
    %30 = vector.load %arg7[%c0_17, %c0_18] : memref<16x132xf32, #tpu.memory_space<vmem>>, vector<16x132xf32>
    tpu.vector_store %arg7[%c0_17, %c0_18], %29 {strides = array<i32>} : memref<16x132xf32, #tpu.memory_space<vmem>>, vector<16x132xf32>,
    %31 = vector.extract_strided_slice %8 {offsets = [16, 2], sizes = [16, 128], strides = [1, 1]} : vector<32x132xf32> to vector<16x128xf32>
    %32 = vector.broadcast %10 : vector<16x1xf32> to vector<16x128xf32>
    %33 = arith.addf %31, %32 : vector<16x128xf32>
    %c0_19 = arith.constant 0 : index
    %c0_20 = arith.constant 0 : index
    %34 = vector.load %arg7[%c0_19, %c0_20] : memref<16x132xf32, #tpu.memory_space<vmem>>, vector<16x128xf32>
    %c0_21 = arith.constant 0 : index
    %c1_22 = arith.constant 1 : index
    %35 = vector.load %arg7[%c0_21, %c1_22] : memref<16x132xf32, #tpu.memory_space<vmem>>, vector<16x128xf32>
    %c0_23 = arith.constant 0 : index
    %c2_24 = arith.constant 2 : index
    %36 = vector.load %arg7[%c0_23, %c2_24] : memref<16x132xf32, #tpu.memory_space<vmem>>, vector<16x128xf32>
    %c0_25 = arith.constant 0 : index
    %c3 = arith.constant 3 : index
    %37 = vector.load %arg7[%c0_25, %c3] : memref<16x132xf32, #tpu.memory_space<vmem>>, vector<16x128xf32>
    %c0_26 = arith.constant 0 : index
    %c4 = arith.constant 4 : index
    %38 = vector.load %arg7[%c0_26, %c4] : memref<16x132xf32, #tpu.memory_space<vmem>>, vector<16x128xf32>
    %39 = tpu.concatenate %34, %35, %36, %37, %38 in 0 : vector<16x128xf32>, vector<16x128xf32>, vector<16x128xf32>, vector<16x128xf32>, vector<16x128xf32> -> vector<80x128xf32>
    %c0_27 = arith.constant 0 : index
    %c0_28 = arith.constant 0 : index
    %40 = vector.load %arg4[%c0_27, %c0_28] : memref<16x80xf32, #tpu.memory_space<vmem>>, vector<16x80xf32>
    %cst_29 = arith.constant dense<0.000000e+00> : vector<16x128xf32>
    %41 = tpu.matmul %40, %39, %cst_29 {dimension_numbers = #tpu.dot_dimension_numbers<[1], [0], [0], [1], [0, 0, 1, 1], [], []>} : vector<16x80xf32>, vector<80x128xf32>, vector<16x128xf32> -> vector<16x128xf32>
    %42 = arith.addf %33, %41 : vector<16x128xf32>
    %cst_30 = arith.constant 0.000000e+00 : f32
    %43 = vector.broadcast %cst_30 : f32 to vector<16x128xf32>
    %44 = arith.maximumf %42, %43 : vector<16x128xf32>
    %c0_31 = arith.constant 0 : index
    %c0_32 = arith.constant 0 : index
    %c0_33 = arith.constant 0 : index
    %45 = vector.load %arg6[%c0_31, %c0_32, %c0_33] : memref<1x16x128xf32, #tpu.memory_space<vmem>>, vector<1x16x128xf32>
    %46 = vector.shape_cast %45 : vector<1x16x128xf32> to vector<16x128xf32>
    %47 = vector.shape_cast %44 : vector<16x128xf32> to vector<1x16x128xf32>
    tpu.vector_store %arg6[%c0_31, %c0_32, %c0_33], %47 {strides = array<i32>} : memref<1x16x128xf32, #tpu.memory_space<vmem>>, vector<1x16x128xf32>,
    return
  }
  func.func @transform_0(%arg0: i32, %arg1: i32) -> (i32, i32, i32, i32) {
    %c0_i32 = arith.constant 0 : i32
    %c0_i32_0 = arith.constant 0 : i32
    %c0_i32_1 = arith.constant 0 : i32
    return %arg0, %arg1, %c0_i32, %c0_i32_0 : i32, i32, i32, i32
  }
  func.func @transform_1(%arg0: i32, %arg1: i32) -> (i32, i32) {
    %c0_i32 = arith.constant 0 : i32
    %c0_i32_0 = arith.constant 0 : i32
    %c0_i32_1 = arith.constant 0 : i32
    return %c0_i32, %c0_i32_0 : i32, i32
  }
  func.func @transform_2(%arg0: i32, %arg1: i32) -> (i32, i32) {
    %c0_i32 = arith.constant 0 : i32
    %c0_i32_0 = arith.constant 0 : i32
    %c0_i32_1 = arith.constant 0 : i32
    return %c0_i32, %c0_i32_0 : i32, i32
  }
  func.func @transform_3(%arg0: i32, %arg1: i32) -> (i32, i32) {
    %c0_i32 = arith.constant 0 : i32
    %c0_i32_0 = arith.constant 0 : i32
    %c0_i32_1 = arith.constant 0 : i32
    return %c0_i32, %c0_i32_0 : i32, i32
  }
  func.func @transform_4(%arg0: i32, %arg1: i32) -> (i32, i32, i32) {
    %c0_i32 = arith.constant 0 : i32
    %c0_i32_0 = arith.constant 0 : i32
    return %arg0, %c0_i32, %arg1 : i32, i32, i32
  }
}

</mosaic_0001>

<bundles_post_ra>
// kernel: tpu_custom_call.1
= control target key start
LH: loop header
LB: loop body
LE: loop exit
PB: predicated region body
PF: predicated region fallthrough
CT: control target
= control target key end

     0   :  { %9 = vsyncpa [#allocation4], 0  ;;  %s1186_s0 = inlined_call_operand.vmem [shape: f32[2,1,8,134], index: 0, kind: input, shape index: {}]   ;;  %s1187_s1 = inlined_call_operand.vmem [shape: f32[32,24], index: 1, kind: input, shape index: {}]   ;;  %s1188_s2 = inlined_call_operand.vmem [shape: f32[16,80], index: 2, kind: input, shape index: {}]   ;;  %s1189_s3 = inlined_call_operand.vmem [shape: f32[16,2], index: 3, kind: input, shape index: {}]   ;;  %s1190_s4 = inlined_call_operand.hbm [shape: f32[2,16,128], index: 4, kind: output, shape index: {}]  }
   0x1   :  { %11 = vsyncpa [#allocation4 + $0x1], 0  ;;  %s997_s15 = smov 0   ;;  %s999_s16 = smov 0  }
   0x2   :  { %s1001_s17 = smov 0   ;;  %s1003_s18 = smov 0  }
   0x3   :  { %s1005_s19 = smov 0   ;;  %s1007_s20 = smov 0  }
   0x4 LB: > { %s681_s21 = sadd.s32 4294967295, %s959_s20   ;;  %s682_s22 = sadd.s32 4294967294, %s959_s20   ;;  %s959_s20 = sphi %s1007_s20, %s17_s20   ;;  %s955_s19 = sphi %s1005_s19, %s1199_s19   ;;  %s951_s18 = sphi %s1003_s18, %s1198_s18   ;;  %s947_s17 = sphi %s1001_s17, %s1197_s17   ;;  %s943_s16 = sphi %s999_s16, %s1196_s16   ;;  %s939_s15 = sphi %s997_s15, %s1195_s15  }
   0x5   : > { %s29_s23 = sadd.s32 1, %s955_s19  ;;  %s129_s24 = sadd.s32 1, %s947_s17 }
   0x6   : > { %p31_p0 = scmp.ge.s32.totalorder %s29_s23, 2  ;;  %p139_p1 = scmp.ne.s32.totalorder %s947_s17, %s943_s16 }
   0x7   : > { %p140_p2 = scmp.eq.s32.totalorder %s681_s21, 1  ;;  %p145_p3 = scmp.ne.s32.totalorder %s943_s16, %s939_s15 }
   0x8   : > { %s1201_s23 = smov (%p31_p0, %s29_s23), 0  ;;  %p146_p5 = scmp.eq.s32.totalorder %s682_s22, 1 }
   0x9   : > { %p1037_p4 = por %p140_p2, %p139_p1  ;;  %s124_s26 = ssub.s32 %s955_s19, %s1201_s23 }
   0xa   : > { %p685_p6 = scmp.ge.s32.totalorder %s959_s20, 1  ;;  %p127_p7 = scmp.eq.s32.totalorder %s124_s26, 0 }
   0xb   : > { %p1044_p8 = por %p146_p5, %p145_p3  ;;  %p185_p9 = scmp.lt.s32.totalorder %s959_s20, 3 }
   0xc   : > { %s1050_s28 = scalar_select %p127_p7, %s947_s17, %s129_s24  }
   0xd   : > { %p186_p10 = pnand %p685_p6, %p185_p9 }
   0xe   : > { %p215_p11 = scmp.lt.s32.totalorder (!%p186_p10), %s951_s18, 1  ;;  %v961_v0 = vmov (!%p186_p10), 0.0   ;;  %vm393_vm0 = vcmask (!%p186_p10), 31744   ;;  %s962_s8 = smov (!%p186_p10), 126   ;;  %v1065_v4 = vld [vmem:[%s1189_s3] sm:$0xff] (!%p186_p10)  ;;  %v964_v5 = vmov (!%p186_p10), 0   ;;  %v370_v18 = vlaneseq (!%p186_p10) }
   0xf   : > { %189 = sbr.rel (%p186_p10) target bundleno = 980 (0x3d4), region = 36  ;;  %325 = vmatprep.mubr.f32.mxu0 (!%p186_p10), %v961_v0  ;;  %394 = vst.msk [vmem:[#allocation2 + $0x8] sm:$0xff] (!%p186_p10), %vm393_vm0, %v961_v0  ;;  %396 = vst.msk [vmem:[#allocation2 + $0x18] sm:$0xff] (!%p186_p10), %vm393_vm0, %v961_v0  ;;  %s963_s9 = smov (!%p186_p10), 127   ;;  %831 = vset.pattern.permute.xlu1 (!%p186_p10), %v964_v5  ;;  %v1072_v6 = vld [vmem:[%s1189_s3 + $0x8] sm:$0xff] (!%p186_p10)  ;;  %vm232_vm1 = vcmask (!%p186_p10), 1039360  }
  0x10   : > { %832 = vset.pattern.permute.xlu0 (!%p186_p10), %v964_v5  ;;  %vm240_vm2 = vcmask (!%p186_p10), 1031168   ;;  %v244_v16 = vld [vmem:[%s1187_s1] sm:$0xff] (!%p186_p10)  ;;  %vm248_vm3 = vcmask (!%p186_p10), 195584   ;;  %v245_v17 = vld [vmem:[%s1187_s1 + $0x8] sm:$0xff] (!%p186_p10)  ;;  %v371_v19 = vand.u32 (!%p186_p10), 127, %v370_v18  ;;  %s965_s26 = smov (!%p186_p10), 125  }
  0x11   : > { %v467_v39 = vld [vmem:[%s1188_s2] sm:$0xff] (!%p186_p10)  ;;  %vm469_vm8 = vcmask (!%p186_p10), 654336   ;;  %v246_v40 = vld [vmem:[%s1187_s1 + $0x10] sm:$0xff] (!%p186_p10)  ;;  %v967_v41 = vmov (!%p186_p10), 1   ;;  %v247_v42 = vld [vmem:[%s1187_s1 + $0x18] sm:$0xff] (!%p186_p10)  ;;  %vm449_vm9 = vcmask (!%p186_p10), 1022976  }
  0x12   : > { %v376_v20 = vadd.s32 (!%p186_p10), 4294967294, %v371_v19  ;;  %734 = vmatprep.mubr.msk.f32.mxu1 (!%p186_p10), %vm469_vm8, %v467_v39  ;;  %vm462_vm10 = vcmask (!%p186_p10), 1014784   ;;  %s968_s13 = smov (!%p186_p10), 2   ;;  %s212_s14 = sand.u32 (!%p186_p10), 1, %s943_s16  }
  0x13   : > { %s686_s21 = sshll.u32 (!%p186_p10), %s212_s14, 4  ;;  %s1140_s5 = scalar_lea.sflag (!%p186_p10), [#allocation4], %s212_s14 }
  0x14   : > { %vm378_vm4 = vcmp.ge.s32.totalorder (!%p186_p10), %v376_v20, 0  ;;  %vm380_vm5 = vcmp.lt.s32.totalorder (!%p186_p10), %v376_v20, 25  ;;  %s214_s22 = scalar_lea.vmem (!%p186_p10), [#allocation3], %s686_s21 }
  0x15   : > { %vm1087_vm6 = vmand (!%p186_p10), %vm378_vm4, %vm380_vm5  ;;  %s600_s24 = sshll.u32 (!%p186_p10), %s214_s22, 4  ;;  %s1132_s24 = int_to_ptr.vmem [resolvable:$true] %s600_s24 }
  0x16   : > { %s216_s29 = scalar_select %p215_p11, %s951_s18, 1  ;;  %v411_v28 = vld [vmem:[#allocation2 + $0x8] sm:$0xff]  ;;  %v412_v35 = vld [vmem:[#allocation2 + $0x18] sm:$0xff]  ;;  %vm875_vm7 = vmpackc.low %vm1087_vm6, %vm1087_vm6 }
  0x17   : > { %s881_s6 = scalar_lea.vmem %s1132_s24, 256 }
  0x18   : > { %s700_s30 = sshll.u32 %s216_s29, 4  ;;  %s966_s29 = smov 124  }
  0x19   : > { %s223_s7 = scalar_lea.vmem %s1186_s0, %s700_s30  ;;  %p882_p12 = scmp.ne.s32.totalorder %s1132_s24, %s881_s6 }
  0x1a   : > { %v224_v1 = vld [vmem:[%s223_s7] sm:$0xff]  ;;  %v225_v2 = vld [vmem:[%s223_s7 + $0x8] sm:$0xff] }
  0x1b   : > { %v826_v3 = vpack.i.bf16 %v225_v2, %v224_v1  ;;  %238 = vrot.lane.b32.xlu1 %v225_v2, %s962_s8  ;;  %p883_p13 = pnand %p882_p12, %p1037_p4 }
  0x1d   : > { %827 = vrot.lane.b32.xlu0 %v826_v3, %s963_s9  ;;  %p884_p0 = pneg %p883_p13 }
  0x1f   : > { %354 = vperm.xlu1 %831, %v1065_v4  }
  0x21   : > { %236 = vrot.lane.b32.xlu0 %v224_v1, %s962_s8 }
  0x23   : > { %874 = vset.pattern.permute.xlu1 %v967_v41 }
  0x25   : > { %359 = vperm.xlu0 %832, %v1072_v6  }
  0x29   : > { %873 = vset.pattern.permute.xlu0 %v967_v41 }
  0x8d   : > { %v239_v13 = vpop.permute.xlu1 %238 }
  0x8f   : > { %v828_v7 = vpop.permute.xlu0 %827 }
  0x90   : > { %v830_v8 = vunpack.i.h.bf16 %v828_v7  ;;  %v829_v9 = vunpack.i.l.bf16 %v828_v7 }
  0x92   : > { %v737_v10 = vpack.c.bf16 %v830_v8, %v225_v2  ;;  %v233_v11 = vsel %vm232_vm1, %v829_v9, %v830_v8 }
  0x93   : > { %v739_v12 = vpack.c.bf16 %v233_v11, %v224_v1  ;;  %v237_v14 = vpop.permute.xlu0 %236 }
  0x94   : > { %738 = vmatprep.subr.bf16.mxu0 %v737_v10  ;;  %v241_v15 = vsel %vm240_vm2, %v237_v14, %v239_v13 }
  0x95   : > { %740 = vmatpush1.bf16.msra.mxu0 %v739_v12 }
  0x96   : > { %265 = vmatprep.subr.mxu0 %v239_v13 }
  0x99   : > { %266 = vmatpush1.msra.mxu0 %v241_v15  ;;  %v468_v15 = vld [vmem:[%s1188_s2 + $0x8] sm:$0xff] }
  0x9a   : > { %689 = vmatmul.mubr.msk.f32.vlgmr.msra.gmra.mrb[0].mxu0 %vm248_vm3, %v244_v16 }
  0x9b   : > { %331 = vmatprep.mubr.f32.mxu0 %v961_v0 }
  0x9e   : > { %690 = vmatmul.mubr.msk.f32.gmra.mrb[2].mxu0 %vm248_vm3, %v245_v17  ;;  %v355_v21 = vpop.permute.xlu1 %354 }
  0x9f   : > { %337 = vmatprep.mubr.f32.mxu0 %v961_v0 }
  0xa2   : > { %691 = vmatmul.mubr.msk.f32.gmra.mrb[4].mxu0 %vm248_vm3, %v246_v40 }
  0xa3   : > { %343 = vmatprep.mubr.f32.mxu0 %v961_v0 }
  0xa4   : > { %v360_v26 = vpop.permute.xlu0 %359 }
  0xa6   : > { %692 = vmatmul.mubr.msk.f32.gmra.mrb[6].mxu0 %vm248_vm3, %v247_v42 }
 0x16d   : > { %v327_v22 = vpop.f32.mrb[0].mxu0 }
 0x16e   : > { %v362_v23 = vadd.f32 %v355_v21, %v327_v22  ;;  %v329_v24 = vpop.f32.mrb[1].mxu0 }
 0x170   : > { %v366_v27 = vmax.f32 %v362_v23, 0.0 }
 0x171   : > { %v333_v29 = vpop.f32.mrb[2].mxu0 }
 0x172   : > { %v388_v30 = vsel %vm1087_vm6, %v366_v27, 0.0  ;;  %v364_v31 = vadd.f32 %v360_v26, %v333_v29  ;;  %v335_v32 = vpop.f32.mrb[3].mxu0 }
 0x173   : > { %v838_v33 = vpack.i.bf16 %v411_v28, %v388_v30 }
 0x174   : > { %v368_v34 = vmax.f32 %v364_v31, 0.0 }
 0x175   : > { %839 = vrot.lane.b32.xlu0 %v838_v33, %s962_s8  ;;  %834 = vrot.lane.b32.xlu1 %v838_v33, %s963_s9  ;;  %v339_v16 = vpop.f32.mrb[4].mxu0 }
 0x176   : > { %v390_v36 = vsel %vm1087_vm6, %v368_v34, 0.0  ;;  %v876_v38 = vpack.c.bf16 %v368_v34, %v366_v27  ;;  %v341_v17 = vpop.f32.mrb[5].mxu0 }
 0x177   : > { %v853_v37 = vpack.i.bf16 %v412_v35, %v390_v36 }
 0x178   : > { %877 = vmatprep.subr.msk.bf16.mxu1 %vm875_vm7, %v876_v38 }
 0x179   : > { %844 = vrot.lane.b32.xlu0 %v838_v33, %s965_s26  ;;  %854 = vrot.lane.b32.xlu1 %v853_v37, %s963_s9  ;;  %v345_v18 = vpop.f32.mrb[6].mxu0 }
 0x17a   : > { %880 = vmatpush3.bf16.msk.msra.mxu1 %vm875_vm7, %v876_v38  ;;  %v347_v19 = vpop.f32.mrb[7].mxu0 }
 0x17d   : > { %849 = vrot.lane.b32.xlu0 %v838_v33, %s966_s29  ;;  %859 = vrot.lane.b32.xlu1 %v853_v37, %s962_s8 }
 0x181   : > { %864 = vrot.lane.b32.xlu1 %v853_v37, %s965_s26  ;;  %398 = vperm.xlu0 %873, %v1065_v4   ;;  %s701_s26 = sshll.u32 %s951_s18, 8  ;;  %s969_s18 = smov [#allocation3]  }
 0x182   : > { %s1137_s30 = scalar_lea.hbm %s1190_s4, %s701_s26  ;;  %s885_s7 = sshll.u32 %s969_s18, 4  ;;  %s886_s7 = int_to_ptr.vmem [resolvable:$false] %s885_s7 }
 0x183   : > { %s887_s9 = scalar_lea.vmem %s886_s7, 512  ;;  %p888_p1 = scmp.lt.s32.totalorder %s1132_s24, %s886_s7 }
 0x184   : > { %p889_p2 = scmp.lt.s32.totalorder %s887_s9, %s881_s6 }
 0x185   : > { %869 = vrot.lane.b32.xlu1 %v853_v37, %s966_s29 }
 0x186   : > { %p890_p3 = por %p889_p2, %p888_p1 }
 0x188   : > { %p891_p5 = pnand %p890_p3, %p884_p0 }
 0x189   : > { %402 = vperm.xlu1 %874, %v1072_v6  }
 0x1e7   : > { %v840_v43 = vpop.permute.xlu0 %839  ;;  %v835_v44 = vpop.permute.xlu1 %834 }
 0x1e8   : > { %v837_v45 = vunpack.i.h.bf16 %v835_v44  ;;  %v836_v46 = vunpack.i.l.bf16 %v835_v44  ;;  %v842_v51 = vunpack.i.h.bf16 %v840_v43  ;;  %v841_v52 = vunpack.i.l.bf16 %v840_v43 }
 0x1ea   : > { %v425_v53 = vsel %vm232_vm1, %v836_v46, %v837_v45  ;;  %v437_v61 = vsel %vm240_vm2, %v841_v52, %v842_v51 }
 0x1eb   : > { %v855_v47 = vpop.permute.xlu1 %854  ;;  %v845_v50 = vpop.permute.xlu0 %844 }
 0x1ec   : > { %v857_v48 = vunpack.i.h.bf16 %v855_v47  ;;  %v856_v49 = vunpack.i.l.bf16 %v855_v47  ;;  %v847_v59 = vunpack.i.h.bf16 %v845_v50  ;;  %v846_v60 = vunpack.i.l.bf16 %v845_v50 }
 0x1ee   : > { %v426_v54 = vsel %vm232_vm1, %v856_v49, %v857_v48  ;;  %v450_v6 = vsel %vm449_vm9, %v846_v60, %v847_v59 }
 0x1ef   : > { %v860_v55 = vpop.permute.xlu1 %859  ;;  %v745_v56 = vpack.c.bf16 %v426_v54, %v425_v53  ;;  %v850_v63 = vpop.permute.xlu0 %849 }
 0x1f0   : > { %v862_v57 = vunpack.i.h.bf16 %v860_v55  ;;  %v861_v58 = vunpack.i.l.bf16 %v860_v55  ;;  %v852_v4 = vunpack.i.h.bf16 %v850_v63  ;;  %v851_v5 = vunpack.i.l.bf16 %v850_v63 }
 0x1f1   : > { %746 = vmatprep.subr.bf16.mxu1 %v745_v56 }
 0x1f2   : > { %748 = vmatpush3.bf16.msra.mxu1 %v745_v56  ;;  %v438_v62 = vsel %vm240_vm2, %v861_v58, %v862_v57  ;;  %v463_v12 = vsel %vm462_vm10, %v851_v5, %v852_v4 }
 0x1f3   : > { %v865_v0 = vpop.permute.xlu1 %864  ;;  %v749_v1 = vpack.c.bf16 %v438_v62, %v437_v61 }
 0x1f4   : > { %v867_v2 = vunpack.i.h.bf16 %v865_v0  ;;  %v866_v3 = vunpack.i.l.bf16 %v865_v0 }
 0x1f5   : > { %750 = vmatprep.subr.bf16.mxu1 %v749_v1 }
 0x1f6   : > { %752 = vmatpush3.bf16.msra.mxu1 %v749_v1  ;;  %v451_v7 = vsel %vm449_vm9, %v866_v3, %v867_v2 }
 0x1f7   : > { %v870_v8 = vpop.permute.xlu1 %869  ;;  %v753_v9 = vpack.c.bf16 %v451_v7, %v450_v6 }
 0x1f8   : > { %v872_v10 = vunpack.i.h.bf16 %v870_v8  ;;  %v871_v11 = vunpack.i.l.bf16 %v870_v8 }
 0x1f9   : > { %754 = vmatprep.subr.bf16.mxu1 %v753_v9 }
 0x1fa   : > { %756 = vmatpush3.bf16.msra.mxu1 %v753_v9  ;;  %v464_v13 = vsel %vm462_vm10, %v871_v11, %v872_v10 }
 0x1fb   : > { %v757_v14 = vpack.c.bf16 %v464_v13, %v463_v12 }
 0x1fd   : > { %758 = vmatprep.subr.bf16.mxu1 %v757_v14 }
 0x1fe   : > { %760 = vmatpush3.bf16.msra.mxu1 %v757_v14 }
 0x200   : > { %v399_v22 = vpop.permute.xlu0 %398 }
 0x201   : > { %735 = vmatmul.mubr.msk.f32.vlgmr.msra.gmra.mrb[0].mxu1 %vm469_vm8, %v468_v15  ;;  %v405_v24 = vadd.f32 %v399_v22, %v339_v16  ;;  %v406_v25 = vadd.f32 %v399_v22, %v341_v17 }
 0x208   : > { %v403_v23 = vpop.permute.xlu1 %402 }
 0x209   : > { %v407_v26 = vadd.f32 %v403_v23, %v345_v18  ;;  %v408_v27 = vadd.f32 %v403_v23, %v347_v19 }
 0x2d4   : > { %v736_v20 = vpop.f32.mrb[0].mxu1 }
 0x2d5   : > { %555 = vrot.lane.b32.xlu0 %v736_v20, %s968_s13  ;;  %v542_v21 = vpop.f32.mrb[1].mxu1 }
 0x2d6   : > { %553 = vrot.lane.b32.xlu1 %v542_v21, %s968_s13 }
 0x347   : > { %v556_v28 = vpop.permute.xlu0 %555 }
 0x348   : > { %v554_v29 = vpop.permute.xlu1 %553  ;;  %v561_v32 = vadd.f32 %v556_v28, %v407_v26  ;;  %v562_v33 = vadd.f32 %v556_v28, %v408_v27 }
 0x349   : > { %v559_v30 = vadd.f32 %v554_v29, %v405_v24  ;;  %v560_v31 = vadd.f32 %v554_v29, %v406_v25 }
 0x34a   : > { %v565_v36 = vmax.f32 %v561_v32, 0.0  ;;  %v566_v37 = vmax.f32 %v562_v33, 0.0 }
 0x34b   : > { %v563_v34 = vmax.f32 %v559_v30, 0.0  ;;  %v564_v35 = vmax.f32 %v560_v31, 0.0 }
 0x34d   : > { %571 = vrot.lane.b32.xlu1 %v563_v34, %s962_s8  ;;  %573 = vrot.lane.b32.xlu0 %v564_v35, %s962_s8 }
 0x351   : > { %575 = vrot.lane.b32.xlu1 %v565_v36, %s962_s8  ;;  %577 = vrot.lane.b32.xlu0 %v566_v37, %s962_s8 }
 0x3bf   : > { %v572_v38 = vpop.permute.xlu1 %571  ;;  %v574_v39 = vpop.permute.xlu0 %573 }
 0x3c0   : > { %v579_v40 = vsel %vm240_vm2, %v572_v38, %v574_v39 }
 0x3c1   : > { %583 = vst [vmem:[%s214_s22] sm:$0xff] %v579_v40 }
 0x3c3   : > { %v576_v41 = vpop.permute.xlu1 %575  ;;  %v578_v42 = vpop.permute.xlu0 %577 }
 0x3c4   : > { %v580_v43 = vsel %vm240_vm2, %v576_v41, %v578_v42 }
 0x3c5   : > { %584 = vst [vmem:[%s214_s22 + $0x8] sm:$0xff] %v580_v43 }
 0x3c6   : > { %894 = shalt.err (!%p891_p5)
}
 0x3c7   : > { %s895_s10 = scalar_lea.hbm %s1137_s30, 256  ;;  %s899_s13 = scalar_lea.hbm %s1190_s4, 512 }
 0x3c8   : > { %p896_p6 = scmp.ne.s32.totalorder %s1137_s30, %s895_s10  ;;  %p900_p10 = scmp.lt.u32.totalorder %s1137_s30, %s1190_s4 }
 0x3c9   : > { %p901_p11 = scmp.lt.u32.totalorder %s899_s13, %s895_s10  ;;  %p903_p13 = scmp.lt.u32.totalorder %s895_s10, %s1137_s30 }
 0x3ca   : > { %p897_p7 = pnand %p896_p6, %p1037_p4 }
 0x3cb   : > { %p902_p12 = por %p901_p11, %p900_p10 }
 0x3cc   : > { %p898_p9 = pneg %p897_p7 }
 0x3cd   : > { %p904_p0 = por %p903_p13, %p902_p12 }
 0x3cf   : > { %p905_p1 = pnand %p904_p0, %p898_p9 }
 0x3d1   : > { %908 = shalt.err (!%p905_p1)
}
 0x3d2   : > { %s970_s22 = smov 128   ;;  %s971_s26 = smov 8  }
 0x3d3   : > { %761 = dma.vmem_to_hbm [thread:$0]  (%p1037_p4), %s1132_s24, 256, %s1137_s30, %s1140_s5, %s970_s22, %s970_s22, %s971_s26  }
 0x3d4 PF: > { %p767_p2 = scmp.ge.s32.totalorder %s959_s20, 2  ;;  %s615_s29 = sand.u32 1, %s939_s15  }
 0x3d5   : > { %s616_s8 = scalar_lea.sflag [#allocation4], %s615_s29 }
 0x3d6   : > { %p764_p3 = pnand %p767_p2, %p1044_p8 }
 0x3d8   : > { %934 = dma.done.wait (!%p764_p3), %s616_s8, 256  }
 0x3d9   : > { %936 = vsyncadd (!%p764_p3), %s616_s8, 4294967040  ;;  %s17_s20 = sadd.s32 1, %s959_s20   ;;  %s1195_s15 = smov %s943_s16 }
 0x3da   : > { %p14_p5 = scmp.ge.s32.totalorder %s17_s20, 4   ;;  %s1196_s16 = smov %s947_s17 }
 0x3db   : > { %s1197_s17 = smov %s1050_s28  ;;  %s1198_s18 = smov %s955_s19 }
 0x3dc   : > { %s1199_s19 = smov %s1201_s23  ;;  %16 = sbr.rel (!%p14_p5) target bundleno = 4 (0x4), region = 71 }
 0x3e3   :  { %621 = vsyncpa [#allocation4], 1 }
 0x3e4   :  { %623 = vsyncpa [#allocation4 + $0x1], 1 }

</bundles_post_ra>
